<compile_context>
chip_gen: v5e
topology: v5e:2x2
jax: 0.10.0
libtpu: 0.0.40
codegen_flags: <defaults>
</compile_context>

<pallas_src>
import functools

import jax
import jax.numpy as jnp
from jax.experimental import pallas as pl
from jax.experimental.pallas import tpu as pltpu


def _round_up(x, m):
    return ((x + m - 1) // m) * m


def _partial_sum_kernel(x_ref, out_ref, acc_ref, *, n_valid, chunk,
                        chunks_per_part, needs_mask):
    """Accumulate per-batch partial sums over one feature partition.

    x_ref:   (B, chunk)  native-dtype tile of the flattened labels
    out_ref: (1, B, 1)   f32 partial sum for this partition
    acc_ref: (B, chunk)  f32 wide running accumulator (VMEM scratch)
    """
    p = pl.program_id(0)          # partition index (parallel axis)
    k = pl.program_id(1)          # chunk index within partition (reduction)

    @pl.when(k == 0)
    def _init():
        acc_ref[...] = jnp.zeros_like(acc_ref)

    x = x_ref[...].astype(jnp.float32)
    if needs_mask:
        # Zero lanes beyond the true feature count. Covers both the partial
        # tail chunk and fully-out-of-range (clamped, duplicate) chunks.
        g = p * chunks_per_part + k                        # global chunk index
        lane = jax.lax.broadcasted_iota(jnp.int32, x.shape, 1)
        x = jnp.where(g * chunk + lane < n_valid, x, 0.0)

    # Hot path: wide elementwise VPU add; no cross-lane work per step.
    acc_ref[...] += x

    @pl.when(k == pl.num_programs(1) - 1)
    def _finalize():
        # One cross-lane reduction per partition.
        out_ref[0] = jnp.sum(acc_ref[...], axis=1, keepdims=True)


@functools.partial(jax.jit, static_argnames=("chunk",))
def cluster_label_generator(gt_labels, *, chunk=4096):
    """JAX/Pallas equivalent of ClusterLabelGenerator.forward.

    gt_labels: (B, C, H, W) array (bool / int / float).
    returns:   (B, 2) bool array; [:, 1] = has foreground, [:, 0] = ~has_fg.
    """
    B = gt_labels.shape[0]
    x = gt_labels.reshape(B, -1)                 # native dtype; no f32 HBM copy
    if x.dtype == jnp.bool_:
        x = x.astype(jnp.int8)                   # 1-byte stream, DMA-friendly
    N = x.shape[1]

    # Chunk: multiple of 128, no larger than the rounded-up feature count.
    chunk = max(128, min(_round_up(chunk, 128), _round_up(N, 128)))
    n_chunks = max(1, pl.cdiv(N, chunk))

    # Feature-partition axis for v7x megacore (serial & harmless on 1-TC chips).
    n_parts = 2 if n_chunks >= 2 else 1
    chunks_per_part = pl.cdiv(n_chunks, n_parts)
    needs_mask = (n_parts * chunks_per_part * chunk) != N

    kernel = functools.partial(
        _partial_sum_kernel,
        n_valid=N,
        chunk=chunk,
        chunks_per_part=chunks_per_part,
        needs_mask=needs_mask,
    )

    # Chunks past the last valid one are clamped onto a valid block; their
    # contribution is zeroed by the in-kernel mask.
    def x_index_map(p, k):
        return (0, jnp.minimum(p * chunks_per_part + k, n_chunks - 1))

    partials = pl.pallas_call(
        kernel,
        out_shape=jax.ShapeDtypeStruct((n_parts, B, 1), jnp.float32),
        grid_spec=pltpu.PrefetchScalarGridSpec(
            num_scalar_prefetch=0,
            grid=(n_parts, chunks_per_part),
            in_specs=[pl.BlockSpec((B, chunk), x_index_map)],
            out_specs=pl.BlockSpec((1, B, 1), lambda p, k: (p, 0, 0)),
            scratch_shapes=[pltpu.VMEM((B, chunk), jnp.float32)],
        ),
        compiler_params=pltpu.CompilerParams(
            dimension_semantics=("parallel", "arbitrary"),
        ),
    )(x)

    total = jnp.sum(partials, axis=(0, 2))       # (B,) tiny cross-partition combine
    has_fg = total > 0
    return jnp.stack([jnp.logical_not(has_fg), has_fg], axis=1)   # (B, 2) bool


def _reference(gt_labels):
    B = gt_labels.shape[0]
    has_fg = gt_labels.reshape(B, -1).sum(axis=1) > 0
    return jnp.stack([jnp.logical_not(has_fg), has_fg], axis=1)


if __name__ == "__main__":
    key = jax.random.PRNGKey(0)
    # N = C*H*W = 1088: not a multiple of 128, exercises partial-chunk masking,
    # the clamped out-of-range chunk, and the 2-partition parallel grid.
    B, C, H, W = 2, 4, 17, 16

    labels = jax.random.bernoulli(key, p=0.05, shape=(B, C, H, W)).astype(jnp.float32)
    labels = labels.at[0].set(0.0)            # batch 0: pure background
    labels = labels.at[1, 0, 0, 0].set(1.0)   # batch 1: guaranteed foreground

    ok = True
    for arr in (labels, labels.astype(jnp.int8)):   # native float and narrow int paths
        ref = _reference(arr)
        for ck in (256, 4096):   # multi-chunk (2-partition) and single-chunk configs
            out = jax.block_until_ready(cluster_label_generator(arr, chunk=ck))
            ok &= (out.shape == (B, 2)) and (out.dtype == jnp.bool_)
            ok &= bool(jnp.all(out == ref))
    assert ok

    print("KERNEL_OK")
</pallas_src>

<mosaic_0001>
module attributes {stable_mosaic.version = 11 : i64} {
  func.func @_partial_sum_kernel(%arg0: i32, %arg1: i32, %arg2: memref<2x256xf32, #tpu.memory_space<vmem>>, %arg3: memref<1x2x1xf32, #tpu.memory_space<vmem>>, %arg4: memref<2x256xf32, #tpu.memory_space<vmem>>) attributes {dimension_semantics = [#tpu.dimension_semantics<parallel>, #tpu.dimension_semantics<arbitrary>], iteration_bounds = array<i64: 2, 3>, scalar_prefetch = 0 : i64, scratch_operands = 1 : i64, tpu.core_type = #tpu.core_type<tc>, window_params = [{transform_indices = @transform_0, window_bounds = array<i64: 2, 256>}, {transform_indices = @transform_1, window_bounds = array<i64: 1, 2, 1>}]} {
    %c0_i32 = arith.constant 0 : i32
    %0 = arith.cmpi eq, %arg1, %c0_i32 : i32
    %1 = arith.extui %0 : i1 to i32
    %c0_i32_0 = arith.constant 0 : i32
    %2 = arith.cmpi ne, %1, %c0_i32_0 : i32
    scf.if %2 {
      %cst_7 = arith.constant 0.000000e+00 : f32
      %20 = vector.broadcast %cst_7 : f32 to vector<2x256xf32>
      %c0_8 = arith.constant 0 : index
      %c0_9 = arith.constant 0 : index
      %21 = vector.load %arg4[%c0_8, %c0_9] : memref<2x256xf32, #tpu.memory_space<vmem>>, vector<2x256xf32>
      tpu.vector_store %arg4[%c0_8, %c0_9], %20 {strides = array<i32>} : memref<2x256xf32, #tpu.memory_space<vmem>>, vector<2x256xf32>,
    } else {
    }
    %c0 = arith.constant 0 : index
    %c0_1 = arith.constant 0 : index
    %3 = vector.load %arg2[%c0, %c0_1] : memref<2x256xf32, #tpu.memory_space<vmem>>, vector<2x256xf32>
    %c3_i32 = arith.constant 3 : i32
    %4 = arith.muli %arg0, %c3_i32 : i32
    %5 = arith.addi %4, %arg1 : i32
    %6 = tpu.iota {dimensions = array<i32: 1>} : vector<2x256xi32>
    %c256_i32 = arith.constant 256 : i32
    %7 = arith.muli %5, %c256_i32 : i32
    %8 = vector.broadcast %7 : i32 to vector<2x256xi32>
    %9 = arith.addi %8, %6 : vector<2x256xi32>
    %c1088_i32 = arith.constant 1088 : i32
    %10 = vector.broadcast %c1088_i32 : i32 to vector<2x256xi32>
    %11 = arith.cmpi slt, %9, %10 : vector<2x256xi32>
    %cst = arith.constant 0.000000e+00 : f32
    %12 = vector.broadcast %cst : f32 to vector<2x256xf32>
    %13 = arith.select %11, %3, %12 : vector<2x256xi1>, vector<2x256xf32>
    %c0_2 = arith.constant 0 : index
    %c0_3 = arith.constant 0 : index
    %14 = vector.load %arg4[%c0_2, %c0_3] : memref<2x256xf32, #tpu.memory_space<vmem>>, vector<2x256xf32>
    %15 = arith.addf %14, %13 : vector<2x256xf32>
    %c0_4 = arith.constant 0 : index
    %c0_5 = arith.constant 0 : index
    %16 = vector.load %arg4[%c0_4, %c0_5] : memref<2x256xf32, #tpu.memory_space<vmem>>, vector<2x256xf32>
    tpu.vector_store %arg4[%c0_4, %c0_5], %15 {strides = array<i32>} : memref<2x256xf32, #tpu.memory_space<vmem>>, vector<2x256xf32>,
    %c2_i32 = arith.constant 2 : i32
    %17 = arith.cmpi eq, %arg1, %c2_i32 : i32
    %18 = arith.extui %17 : i1 to i32
    %c0_i32_6 = arith.constant 0 : i32
    %19 = arith.cmpi ne, %18, %c0_i32_6 : i32
    scf.if %19 {
      %c0_7 = arith.constant 0 : index
      %c0_8 = arith.constant 0 : index
      %20 = vector.load %arg4[%c0_7, %c0_8] : memref<2x256xf32, #tpu.memory_space<vmem>>, vector<2x256xf32>
      %cst_9 = arith.constant dense<0.000000e+00> : vector<2xf32>
      %21 = vector.multi_reduction <add>, %20, %cst_9 [1] : vector<2x256xf32> to vector<2xf32>
      %22 = vector.shape_cast %21 : vector<2xf32> to vector<2x1xf32>
      %c0_10 = arith.constant 0 : index
      %c0_11 = arith.constant 0 : index
      %c0_12 = arith.constant 0 : index
      %23 = vector.load %arg3[%c0_10, %c0_11, %c0_12] : memref<1x2x1xf32, #tpu.memory_space<vmem>>, vector<1x2x1xf32>
      %24 = vector.shape_cast %23 : vector<1x2x1xf32> to vector<2x1xf32>
      %25 = vector.shape_cast %22 : vector<2x1xf32> to vector<1x2x1xf32>
      tpu.vector_store %arg3[%c0_10, %c0_11, %c0_12], %25 {strides = array<i32>} : memref<1x2x1xf32, #tpu.memory_space<vmem>>, vector<1x2x1xf32>,
    } else {
    }
    return
  }
  func.func @transform_0(%arg0: i32, %arg1: i32) -> (i32, i32) {
    %c3_i32 = arith.constant 3 : i32
    %0 = arith.muli %arg0, %c3_i32 : i32
    %1 = arith.addi %0, %arg1 : i32
    %c4_i32 = arith.constant 4 : i32
    %2 = arith.minsi %1, %c4_i32 : i32
    %c0_i32 = arith.constant 0 : i32
    %c0_i32_0 = arith.constant 0 : i32
    return %c0_i32, %2 : i32, i32
  }
  func.func @transform_1(%arg0: i32, %arg1: i32) -> (i32, i32, i32) {
    %c0_i32 = arith.constant 0 : i32
    %c0_i32_0 = arith.constant 0 : i32
    %c0_i32_1 = arith.constant 0 : i32
    return %arg0, %c0_i32, %c0_i32_0 : i32, i32, i32
  }
}

</mosaic_0001>

<bundles_post_ra>
// kernel: cluster_label_generator.1
= control target key start
LH: loop header
LB: loop body
LE: loop exit
PB: predicated region body
PF: predicated region fallthrough
CT: control target
= control target key end

     0   :  { %s398_s6 = smov 0   ;;  %s400_s7 = smov 0   ;;  %s457_s0 = inlined_call_operand.vmem [shape: f32[2,1088], index: 0, kind: input, shape index: {}]   ;;  %s458_s1 = inlined_call_operand.vmem [shape: f32[2,2,1], index: 1, kind: output, shape index: {}]  }
   0x1   :  { %s402_s8 = smov 0   ;;  %s404_s9 = smov 0  }
   0x2   :  { %s406_s10 = smov 0  }
   0x3 LB: > { %s20_s11 = sadd.s32 1, %s377_s8  ;;  %s23_s12 = sadd.s32 1, %s381_s9  ;;  %s385_s10 = sphi %s406_s10, %s11_s10   ;;  %s381_s9 = sphi %s404_s9, %s462_s9   ;;  %s377_s8 = sphi %s402_s8, %s461_s8   ;;  %s373_s7 = sphi %s400_s7, %s460_s7   ;;  %s369_s6 = sphi %s398_s6, %s459_s6  }
   0x4   : > { %p21_p0 = scmp.ge.s32.totalorder %s20_s11, 3  ;;  %p297_p1 = scmp.ge.s32.totalorder %s385_s10, 1 }
   0x5   : > { %p124_p2 = scmp.lt.s32.totalorder %s385_s10, 7 }
   0x6   : > { %s464_s11 = smov (%p21_p0, %s20_s11), 0  ;;  %s466_s12 = smov (!%p21_p0, %s23_s12), %s381_s9 }
   0x7   : > { %p125_p3 = pnand %p297_p1, %p124_p2  ;;  %p25_p4 = scmp.ge.s32.totalorder %s466_s12, 2 }
   0x8   : > { %s151_s13 = smul.u32 (!%p125_p3), 3, %s373_s7  ;;  %p173_p5 = scmp.lt.s32.totalorder (!%p125_p3), %s373_s7, 1 }
   0x9   : > { %s468_s12 = smov (%p25_p4, %s466_s12), 0  ;;  %128 = sbr.rel (%p125_p3) target bundleno = 177 (0xb1), region = 24 }
   0xa   : > { %s152_s14 = sadd.s32 (!%p125_p3), %s369_s6, %s151_s13  ;;  %p301_p8 = scmp.ne.s32.totalorder (!%p125_p3), %s369_s6, 0 }
   0xb   : > { %p153_p6 = scmp.lt.s32.totalorder (!%p125_p3), %s152_s14, 4 }
   0xe   : > { %s470_s7 = smov (!%p173_p5, %s373_s7), 1 }
   0xf   : > { %s154_s15 = scalar_select %p153_p6, %s152_s14, 4 }
  0x10   : > { %s300_s16 = sshll.u32 %s470_s7, 1 }
  0x11   : > { %s298_s17 = sshll.u32 %s154_s15, 1  ;;  %s434_s20 = scalar_lea.vmem %s458_s1, %s300_s16 }
  0x12   : > { %p160_p7 = scmp.lt.s32.totalorder %s298_s17, 8  ;;  %180 = sbr.rel (%p301_p8) target bundleno = 25 (0x19), region = 28 }
  0x14   : > { %s472_s17 = smov (!%p160_p7, %s298_s17), 8 }
  0x15   : > { %s299_s21 = sshll.u32 %s472_s17, 1 }
  0x16   : > { %s163_s24 = scalar_lea.vmem %s457_s0, %s299_s21 }
  0x17   : > { %v387_v0 = vmov 0.0  }
  0x18   : > { %181 = vst [vmem:[#allocation2] sm:$0xf] %v387_v0 }
  0x19 PF: > { %v182_v1 = vld [vmem:[%s163_s24] sm:$0xf]  ;;  %v185_v2 = vlaneseq  ;;  %s302_s25 = sshll.u32 %s152_s14, 8  ;;  %vm206_vm2 = vcmask 1041408   ;;  %p303_p9 = scmp.ne.s32.totalorder %s369_s6, 2 }
  0x1a   : > { %195 = vst [vmem:[#allocation1] ss:$4 sm:$0xff] %v182_v1  ;;  %v189_v3 = vstv %s302_s25 }
  0x1b   : > { %v186_v4 = vand.u32 127, %v185_v2 }
  0x1d   : > { %v187_v5 = vadd.s32 128, %v186_v4  ;;  %v190_v6 = vadd.s32 %v189_v3, %v186_v4 }
  0x1f   : > { %v191_v7 = vadd.s32 %v189_v3, %v187_v5  ;;  %vm192_vm0 = vcmp.lt.s32.totalorder %v190_v6, 1088  ;;  %v202_v11 = vld [vmem:[#allocation2] sm:$0xf] }
  0x21   : > { %vm193_vm1 = vcmp.lt.s32.totalorder %v191_v7, 1088  ;;  %v196_v8 = vld.sshfl [vmem:[#allocation1] sm:$0xff pattern:$0x73625140] }
  0x22   : > { %v197_v9 = vld.sshfl [vmem:[#allocation1 + $0x8] sm:$0xff pattern:$0x73625140]  ;;  %v200_v13 = vsel %vm192_vm0, %v196_v8, 0.0 }
  0x23   : > { %v201_v10 = vsel %vm193_vm1, %v197_v9, 0.0 }
  0x24   : > { %v205_v12 = vrot.slane %v201_v10, 6 }
  0x25   : > { %214 = sbr.rel (%p303_p9) target bundleno = 177 (0xb1), region = 32 }
  0x26   : > { %v207_v14 = vsel %vm206_vm2, %v200_v13, %v205_v12 }
  0x27   : > { %v209_v15 = vadd.f32 %v207_v14, %v202_v11 }
  0x29   : > { %210 = vst [vmem:[#allocation2] sm:$0xf] %v209_v15 }
  0x2a   : > { %vm227_vm3 = vcmask 1024  }
  0x30   : > { %v215_v16 = vld [vmem:[#allocation2] sm:$0xf] }
  0x31   : > { %217 = vst [vmem:[#allocation1] ss:$4 sm:$0xff] %v215_v16 }
  0x38   : > { %v218_v17 = vld.sshfl [vmem:[#allocation1] sm:$0xff pattern:$0x73625140]  ;;  %v219_v18 = vld.sshfl [vmem:[#allocation1 + $0x8] sm:$0xff pattern:$0x73625140] }
  0x39   : > { %v222_v19 = vsel %vm206_vm2, %v218_v17, 0.0  ;;  %v223_v20 = vsel %vm206_vm2, %v219_v18, 0.0 }
  0x3a   : > { %v224_v21 = vadd.f32 %v223_v20, %v222_v19 }
  0x3c   : > { %225 = vadd.xlane.f32.xlu0 %v224_v21 }
  0xaf   : > { %v226_v22 = vpop.xlane.xlu0 %225 }
  0xb0   : > { %228 = vst.msk [vmem:[%s434_s20] sm:$0x3] %vm227_vm3, %v226_v22 }
  0xb1 PF: > { %s11_s10 = sadd.s32 1, %s385_s10   ;;  %s459_s6 = smov %s377_s8 }
  0xb2   : > { %p8_p10 = scmp.ge.s32.totalorder %s11_s10, 8   ;;  %s460_s7 = smov %s381_s9 }
  0xb3   : > { %s461_s8 = smov %s464_s11  ;;  %s462_s9 = smov %s468_s12 }
  0xb4   :  { %10 = sbr.rel (!%p8_p10) target bundleno = 3 (0x3), region = 62 }

</bundles_post_ra>
